<compile_context>
chip_gen: v6e
topology: v6e:2x2x1
jax: 0.10.0
libtpu: 0.0.40
codegen_flags: <defaults>
</compile_context>

<pallas_src>
import jax
import jax.numpy as jnp
from jax.experimental import pallas as pl
from jax.experimental.pallas import tpu as pltpu


_LANES = 128
_TN_MAX = 2048                       # max lane-tile width (multiple of 128)
_TM_MAX = 2048                       # max row-tile height
_TILE_BYTE_BUDGET = 4 * 1024 * 1024  # per tile buffer; ~4 double-buffered copies <= 16 MiB


def _round_up(v, m):
    return (v + m - 1) // m * m


def _add_bias_kernel(x_ref, b_ref, o_ref):
    # x_ref: (tm, tn) tile, b_ref: (1, tn) bias row broadcast over sublanes.
    o_ref[...] = x_ref[...] + b_ref[...]


def add_bias(x, bias_param):
    """Pallas implementation of AddBias.forward.

    Args:
      x: jnp array, either (N, F) or (B, D1, D2, F).
      bias_param: jnp array of shape (F, 1), the module parameter.
    Returns:
      x + bias broadcast along the last axis, same shape/dtype as x.
    """
    F = bias_param.shape[0]
    assert x.shape[-1] == F, "bias length must match last dim of x"
    dtype = x.dtype
    itemsize = jnp.dtype(dtype).itemsize
    sublane = max(8, 32 // itemsize)  # 8 (f32), 16 (bf16), 32 (int8/fp8)

    # .t().view(1, -1) / .t().view(1, 1, 1, -1) -> a (1, F) row for the kernel.
    bias_row = bias_param.T.reshape(1, F).astype(dtype)

    orig_shape = x.shape
    x2 = x.reshape(-1, F)
    M = x2.shape[0]

    # --- lane folding: make output lane-dense when F < 128 -------------------
    fold = 1
    if F < _LANES and _LANES % F == 0:
        fold = _LANES // F
    if fold > 1:
        pad_rows = (-M) % fold
        if pad_rows:
            x2 = jnp.pad(x2, ((0, pad_rows), (0, 0)))
        Mk = x2.shape[0] // fold
        Fk = fold * F
        x2 = x2.reshape(Mk, Fk)
        bias_row = jnp.tile(bias_row, (1, fold))
    else:
        Mk, Fk = M, F

    # --- lane (F) tiling ------------------------------------------------------
    if Fk <= _TN_MAX:
        tn, Fp = Fk, Fk                      # full extent satisfies the (8,128) rule
    else:
        tn = _TN_MAX                         # multiple of 128
        Fp = _round_up(Fk, tn)
    if Fp != Fk:
        x2 = jnp.pad(x2, ((0, 0), (0, Fp - Fk)))
        bias_row = jnp.pad(bias_row, ((0, 0), (0, Fp - Fk)))

    # --- row (M) tiling: biggest dtype-aligned tile under the VMEM budget ----
    tm = _TILE_BYTE_BUDGET // (tn * itemsize)
    tm = max(sublane, min(_TM_MAX, tm) // sublane * sublane)
    tm = min(tm, _round_up(Mk, sublane))     # never bigger than the (padded) data
    Mp = _round_up(Mk, tm)
    if Mp != Mk:
        x2 = jnp.pad(x2, ((0, Mp - Mk), (0, 0)))

    grid = (Mp // tm, Fp // tn)
    cost = pl.CostEstimate(
        flops=Mp * Fp,
        transcendentals=0,
        bytes_accessed=2 * Mp * Fp * itemsize + Fp * itemsize,
    )

    out = pl.pallas_call(
        _add_bias_kernel,
        out_shape=jax.ShapeDtypeStruct((Mp, Fp), dtype),
        grid=grid,
        in_specs=[
            pl.BlockSpec((tm, tn), lambda i, j: (i, j)),  # x tile
            pl.BlockSpec((1, tn), lambda i, j: (0, j)),   # bias row, reused across i
        ],
        out_specs=pl.BlockSpec((tm, tn), lambda i, j: (i, j)),
        compiler_params=pltpu.CompilerParams(
            dimension_semantics=("parallel", "parallel"),
            vmem_limit_bytes=32 * 1024 * 1024,
        ),
        cost_estimate=cost,
    )(x2, bias_row)

    # Undo padding / folding.
    out = out[:Mk, :Fk]
    if fold > 1:
        out = out.reshape(Mk * fold, F)[:M]
    return out.reshape(orig_shape)


if __name__ == "__main__":
    key = jax.random.PRNGKey(0)
    k_b2, k_x2, k_b4, k_x4, k_b5, k_x5, k_b6, k_x6 = jax.random.split(key, 8)

    # ---- 2D case: x (N, F), bias param (F, 1), small F -> lane folding path ----
    N, F2 = 8, 32
    bias2 = jax.random.normal(k_b2, (F2,), dtype=jnp.float32).reshape(F2, 1)
    x2 = jax.random.normal(k_x2, (N, F2), dtype=jnp.float32)
    out2 = jax.block_until_ready(add_bias(x2, bias2))
    ref2 = x2 + bias2.T.reshape(1, -1)
    assert out2.shape == x2.shape and out2.dtype == x2.dtype
    assert jnp.allclose(out2, ref2, atol=1e-6), "2D mismatch"

    # ---- 4D case: x (B, D1, D2, F), bias param (F, 1) ----
    B, D1, D2, F4 = 2, 4, 8, 16
    bias4 = jax.random.normal(k_b4, (F4,), dtype=jnp.float32).reshape(F4, 1)
    x4 = jax.random.normal(k_x4, (B, D1, D2, F4), dtype=jnp.float32)
    out4 = jax.block_until_ready(add_bias(x4, bias4))
    ref4 = x4 + bias4.T.reshape(1, 1, 1, -1)
    assert out4.shape == x4.shape and out4.dtype == x4.dtype
    assert jnp.allclose(out4, ref4, atol=1e-6), "4D mismatch"

    # ---- 2D case, F >= 128 and M not a multiple of 8 -> row-padding path ----
    N5, F5 = 40, 256
    bias5 = jax.random.normal(k_b5, (F5,), dtype=jnp.float32).reshape(F5, 1)
    x5 = jax.random.normal(k_x5, (N5, F5), dtype=jnp.float32)
    out5 = jax.block_until_ready(add_bias(x5, bias5))
    ref5 = x5 + bias5.T.reshape(1, -1)
    assert out5.shape == x5.shape and jnp.allclose(out5, ref5, atol=1e-6), "pad mismatch"

    # ---- bf16 case: sublane-packing-aligned tiles ----
    N6, F6 = 48, 128
    bias6 = jax.random.normal(k_b6, (F6,), dtype=jnp.float32).reshape(F6, 1).astype(jnp.bfloat16)
    x6 = jax.random.normal(k_x6, (N6, F6), dtype=jnp.float32).astype(jnp.bfloat16)
    out6 = jax.block_until_ready(add_bias(x6, bias6))
    ref6 = x6 + bias6.T.reshape(1, -1)
    assert out6.shape == x6.shape and out6.dtype == x6.dtype
    assert jnp.allclose(out6.astype(jnp.float32), ref6.astype(jnp.float32), atol=1e-2), "bf16 mismatch"

    print("KERNEL_OK")
</pallas_src>

<mosaic_0001>
module attributes {stable_mosaic.version = 11 : i64} {
  func.func @_add_bias_kernel(%arg0: i32, %arg1: i32, %arg2: memref<8x128xf32, #tpu.memory_space<vmem>>, %arg3: memref<1x128xf32, #tpu.memory_space<vmem>>, %arg4: memref<8x128xf32, #tpu.memory_space<vmem>>) attributes {dimension_semantics = [#tpu.dimension_semantics<parallel>, #tpu.dimension_semantics<parallel>], iteration_bounds = array<i64: 1, 1>, scalar_prefetch = 0 : i64, scratch_operands = 0 : i64, tpu.core_type = #tpu.core_type<tc>, window_params = [{transform_indices = @transform_0, window_bounds = array<i64: 8, 128>}, {transform_indices = @transform_1, window_bounds = array<i64: 1, 128>}, {transform_indices = @transform_2, window_bounds = array<i64: 8, 128>}]} {
    %c0 = arith.constant 0 : index
    %c0_0 = arith.constant 0 : index
    %0 = vector.load %arg2[%c0, %c0_0] : memref<8x128xf32, #tpu.memory_space<vmem>>, vector<8x128xf32>
    %c0_1 = arith.constant 0 : index
    %c0_2 = arith.constant 0 : index
    %1 = vector.load %arg3[%c0_1, %c0_2] : memref<1x128xf32, #tpu.memory_space<vmem>>, vector<1x128xf32>
    %2 = vector.broadcast %1 : vector<1x128xf32> to vector<8x128xf32>
    %3 = arith.addf %0, %2 : vector<8x128xf32>
    %c0_3 = arith.constant 0 : index
    %c0_4 = arith.constant 0 : index
    %4 = vector.load %arg4[%c0_3, %c0_4] : memref<8x128xf32, #tpu.memory_space<vmem>>, vector<8x128xf32>
    tpu.vector_store %arg4[%c0_3, %c0_4], %3 {strides = array<i32>} : memref<8x128xf32, #tpu.memory_space<vmem>>, vector<8x128xf32>,
    return
  }
  func.func @transform_0(%arg0: i32, %arg1: i32) -> (i32, i32) {
    %c0_i32 = arith.constant 0 : i32
    return %arg0, %arg1 : i32, i32
  }
  func.func @transform_1(%arg0: i32, %arg1: i32) -> (i32, i32) {
    %c0_i32 = arith.constant 0 : i32
    %c0_i32_0 = arith.constant 0 : i32
    return %c0_i32, %arg1 : i32, i32
  }
  func.func @transform_2(%arg0: i32, %arg1: i32) -> (i32, i32) {
    %c0_i32 = arith.constant 0 : i32
    return %arg0, %arg1 : i32, i32
  }
}

</mosaic_0001>

<bundles_post_ra>
// kernel: tpu_custom_call.1
= control target key start
LH: loop header
LB: loop body
LE: loop exit
PB: predicated region body
PF: predicated region fallthrough
CT: control target
= control target key end

     0   :  { %7 = vsyncpa [#allocation3], 0  ;;  %s122_s0 = inlined_call_operand.hbm [shape: f32[8,128], index: 0, kind: input, shape index: {}]   ;;  %s123_s1 = inlined_call_operand.vmem [shape: f32[1,128], index: 1, kind: input, shape index: {}]   ;;  %s124_s2 = inlined_call_operand.hbm [shape: f32[8,128], index: 2, kind: output, shape index: {}]  }
   0x1   :  { %8 = vsyncpa [#allocation4], 0  ;;  %s96_s9 = smov [#allocation2]  }
   0x2   :  { %s15_s10 = sshll.u32 %s96_s9, 4  ;;  %s16_s10 = int_to_ptr.vmem [resolvable:$true] %s15_s10 }
   0x3   :  { %s60_s11 = scalar_lea.vmem %s16_s10, 128  ;;  %p65_p1 = scmp.lt.s32.totalorder %s16_s10, %s16_s10 }
   0x4   :  { %p61_p0 = scmp.ne.s32.totalorder %s16_s10, %s60_s11  ;;  %p66_p2 = scmp.lt.s32.totalorder %s60_s11, %s60_s11 }
   0x6   :  { %p67_p3 = por %p66_p2, %p65_p1 }
   0x8   :  { %p68_p4 = pnand %p67_p3, %p61_p0 }
   0xa   :  { %71 = shalt.err (!%p68_p4)
}
   0xb   :  { %18 = dma.hbm_to_vmem [thread:$0]  %s122_s0, 128, %s16_s10, [#allocation3]  }
   0xc   :  { %92 = dma.done.wait [#allocation3], 128  }
   0xd   :  { %93 = vsyncadd [#allocation3], 4294967168  ;;  %s97_s14 = smov [#allocation5]   ;;  %v24_v0 = vld [vmem:[#allocation2] sm:$0xff] }
   0xe   :  { %s40_s15 = sshll.u32 %s97_s14, 4  ;;  %v49_v1 = vld [vmem:[%s123_s1] ss:$0 sm:$0xff]  ;;  %s41_s15 = int_to_ptr.vmem [resolvable:$true] %s40_s15 }
   0xf   :  { %v32_v2 = vadd.f32 %v49_v1, %v24_v0  ;;  %s72_s18 = scalar_lea.vmem %s41_s15, 128  ;;  %p77_p6 = scmp.lt.s32.totalorder %s41_s15, %s41_s15 }
  0x10   :  { %p73_p5 = scmp.ne.s32.totalorder %s41_s15, %s72_s18  ;;  %p78_p7 = scmp.lt.s32.totalorder %s72_s18, %s72_s18 }
  0x11   :  { %33 = vst [vmem:[#allocation5] sm:$0xff] %v32_v2 }
  0x12   :  { %p79_p8 = por %p78_p7, %p77_p6 }
  0x14   :  { %p80_p9 = pnand %p79_p8, %p73_p5 }
  0x16   :  { %83 = shalt.err (!%p80_p9)
}
  0x17   :  { %43 = dma.vmem_to_hbm [thread:$0]  %s41_s15, 128, %s124_s2, [#allocation4]  }
  0x18   :  { %94 = dma.done.wait [#allocation4], 128  }
  0x19   :  { %95 = vsyncadd [#allocation4], 4294967168 }
  0x1a   :  { %47 = vsyncpa [#allocation3], 1 }
  0x1b   :  { %48 = vsyncpa [#allocation4], 1 }

</bundles_post_ra>
